<compile_context>
chip_gen: v6e
topology: v6e:2x2x1
jax: 0.10.0
libtpu: 0.0.40
codegen_flags: <defaults>
</compile_context>

<pallas_src>
import jax
import jax.numpy as jnp
from jax.experimental import pallas as pl
from jax.experimental.pallas import tpu as pltpu


# --------------------------- Pallas kernel ----------------------------------

def _ca_kernel(x_ref, w1t_ref, b1_ref, w2_ref, b2_ref, o_ref):
    # Block shapes:
    #   x    (Bt, C, HWp)   activations (native dtype, HWp lane-dense)
    #   w1t  (C, Cr)        FC1 weight^T with 1/HW folded in (f32)
    #   b1   (1, Cr)        FC1 bias (f32)
    #   w2   (C, Cr)        FC2 weight (f32)
    #   b2   (1, C)         FC2 bias (f32)

    # Global average pool: spatial SUM accumulated in f32 (padded lanes are 0,
    # the 1/HW factor lives in w1t).  Lane reduction on the XLU.
    s = jnp.sum(x_ref[...].astype(jnp.float32), axis=2)                # (Bt, C)

    # FC1 (1x1 conv C->Cr) + ReLU, kept on the VPU (tiny dims waste the MXU).
    h = jnp.sum(s[:, :, None] * w1t_ref[...][None, :, :], axis=1)      # (Bt, Cr)
    h = jnp.maximum(h + b1_ref[...], 0.0)

    # FC2 (1x1 conv Cr->C), also on the VPU.
    g = jnp.sum(h[:, None, :] * w2_ref[...][None, :, :], axis=2)       # (Bt, C)
    g = g + b2_ref[...]

    # Numerically stable sigmoid: EUP exp + approximate reciprocal.
    e = jnp.exp(-jnp.abs(g))
    y = jnp.where(g >= 0.0, 1.0, e) * pl.reciprocal(1.0 + e, approx=True)

    # Re-read the tile from VMEM (don't keep an f32 copy live across the FC
    # path) and scale in the tile's native dtype -> lane-dense unmasked vst.
    o_ref[...] = x_ref[...] * y[:, :, None].astype(o_ref.dtype)


# --------------------------- wrapper -----------------------------------------

def _pick_batch_tile(B, C, HWp, itemsize, vmem_budget=24 << 20):
    """Largest batch tile that fits the VMEM budget, keeping >=2 grid steps."""
    per_b = 4 * C * HWp * itemsize            # in + out, double-buffered
    bt = max(1, min(B, vmem_budget // per_b))
    if B >= 2:
        bt = min(bt, (B + 1) // 2)            # keep grid >= 2 for v7x megacore
    while B % bt != 0:                        # need an even split for BlockSpec
        bt -= 1
    return bt


def ca_layer(x, w1, b1, w2, b2):
    """CALayer forward.

    x : (B, C, H, W)  NCHW, like the PyTorch module
    w1: (Cr, C, 1, 1) conv_du[0].weight,  b1: (Cr,)
    w2: (C, Cr, 1, 1) conv_du[2].weight,  b2: (C,)
    """
    B, C, H, W = x.shape
    Cr = w1.shape[0]
    HW = H * W
    HWp = max(128, ((HW + 127) // 128) * 128)         # lane-dense spatial axis

    x3 = x.reshape(B, C, HW)
    if HWp != HW:
        x3 = jnp.pad(x3, ((0, 0), (0, 0), (0, HWp - HW)))

    # Fold 1/HW of AdaptiveAvgPool2d(1) into the first FC weight; padded zero
    # columns contribute nothing to the in-kernel spatial sum.
    w1t = (jnp.transpose(w1.reshape(Cr, C)) / HW).astype(jnp.float32)  # (C, Cr)
    w2m = w2.reshape(C, Cr).astype(jnp.float32)                        # (C, Cr)
    b1r = b1.reshape(1, Cr).astype(jnp.float32)
    b2r = b2.reshape(1, C).astype(jnp.float32)

    itemsize = jnp.dtype(x.dtype).itemsize
    bt = _pick_batch_tile(B, C, HWp, itemsize)
    grid = (B // bt,)

    tile_bytes = bt * C * HWp * itemsize
    vmem_limit = int(min(48 << 20, max(16 << 20, 4 * tile_bytes + (4 << 20))))
    cost = pl.CostEstimate(
        flops=2 * B * C * HW + 4 * B * C * Cr,
        transcendentals=B * C,
        bytes_accessed=2 * B * C * HWp * itemsize,
    )

    out = pl.pallas_call(
        _ca_kernel,
        out_shape=jax.ShapeDtypeStruct((B, C, HWp), x.dtype),
        grid_spec=pltpu.PrefetchScalarGridSpec(
            num_scalar_prefetch=0,
            grid=grid,
            in_specs=[
                pl.BlockSpec((bt, C, HWp), lambda b: (b, 0, 0)),   # activations
                pl.BlockSpec((C, Cr), lambda b: (0, 0)),           # weights stay resident
                pl.BlockSpec((1, Cr), lambda b: (0, 0)),
                pl.BlockSpec((C, Cr), lambda b: (0, 0)),
                pl.BlockSpec((1, C), lambda b: (0, 0)),
            ],
            out_specs=pl.BlockSpec((bt, C, HWp), lambda b: (b, 0, 0)),
        ),
        compiler_params=pltpu.CompilerParams(
            dimension_semantics=("parallel",),   # shard batch tiles across TCs
            vmem_limit_bytes=vmem_limit,
        ),
        cost_estimate=cost,
    )(x3, w1t, b1r, w2m, b2r)

    if HWp != HW:
        out = out[:, :, :HW]
    return out.reshape(B, C, H, W)


# --------------------------- reference (pure JAX) -----------------------------

def ca_layer_ref(x, w1, b1, w2, b2):
    Cr, C = w1.shape[0], w1.shape[1]
    m = x.mean(axis=(2, 3))                                   # (B, C)
    h = jnp.maximum(m @ w1.reshape(Cr, C).T + b1, 0.0)        # (B, Cr)
    y = jax.nn.sigmoid(h @ w2.reshape(C, Cr).T + b2)          # (B, C)
    return x * y[:, :, None, None]


# --------------------------- main ---------------------------------------------

if __name__ == "__main__":
    key = jax.random.PRNGKey(0)
    kx, k1, k2, k3, k4, kx2 = jax.random.split(key, 6)

    B, C, reduction = 2, 32, 16
    Cr = max(C // reduction, 1)

    w1 = 0.1 * jax.random.normal(k1, (Cr, C, 1, 1), jnp.float32)
    b1 = 0.1 * jax.random.normal(k2, (Cr,), jnp.float32)
    w2 = 0.1 * jax.random.normal(k3, (C, Cr, 1, 1), jnp.float32)
    b2 = 0.1 * jax.random.normal(k4, (C,), jnp.float32)

    fn = jax.jit(ca_layer)

    # Case 1: 128-aligned spatial (16x16 = 256 lanes).
    x = jax.random.normal(kx, (B, C, 16, 16), jnp.float32)
    out = jax.block_until_ready(fn(x, w1, b1, w2, b2))
    ref = ca_layer_ref(x, w1, b1, w2, b2)
    assert out.shape == x.shape, out.shape
    assert bool(jnp.all(jnp.isfinite(out)))
    assert bool(jnp.allclose(out, ref, rtol=5e-3, atol=5e-3)), \
        float(jnp.max(jnp.abs(out - ref)))

    # Case 2: non-aligned spatial (15x15 -> padded to 256 lanes in-wrapper).
    x2 = jax.random.normal(kx2, (B, C, 15, 15), jnp.float32)
    out2 = jax.block_until_ready(jax.jit(ca_layer)(x2, w1, b1, w2, b2))
    ref2 = ca_layer_ref(x2, w1, b1, w2, b2)
    assert out2.shape == x2.shape, out2.shape
    assert bool(jnp.all(jnp.isfinite(out2)))
    assert bool(jnp.allclose(out2, ref2, rtol=5e-3, atol=5e-3)), \
        float(jnp.max(jnp.abs(out2 - ref2)))

    print("KERNEL_OK")
</pallas_src>

<mosaic_0001>
module attributes {stable_mosaic.version = 11 : i64} {
  func.func @_ca_kernel(%arg0: i32, %arg1: memref<1x32x256xf32, #tpu.memory_space<vmem>>, %arg2: memref<32x2xf32, #tpu.memory_space<vmem>>, %arg3: memref<1x2xf32, #tpu.memory_space<vmem>>, %arg4: memref<32x2xf32, #tpu.memory_space<vmem>>, %arg5: memref<1x32xf32, #tpu.memory_space<vmem>>, %arg6: memref<1x32x256xf32, #tpu.memory_space<vmem>>) attributes {dimension_semantics = [#tpu.dimension_semantics<parallel>], iteration_bounds = array<i64: 2>, scalar_prefetch = 0 : i64, scratch_operands = 0 : i64, tpu.core_type = #tpu.core_type<tc>, window_params = [{transform_indices = @transform_0, window_bounds = array<i64: 1, 32, 256>}, {pipeline_mode = #tpu.pipeline_mode<synchronous>, transform_indices = @transform_1, window_bounds = array<i64: 32, 2>}, {pipeline_mode = #tpu.pipeline_mode<synchronous>, transform_indices = @transform_2, window_bounds = array<i64: 1, 2>}, {pipeline_mode = #tpu.pipeline_mode<synchronous>, transform_indices = @transform_3, window_bounds = array<i64: 32, 2>}, {pipeline_mode = #tpu.pipeline_mode<synchronous>, transform_indices = @transform_4, window_bounds = array<i64: 1, 32>}, {transform_indices = @transform_5, window_bounds = array<i64: 1, 32, 256>}]} {
    %c0 = arith.constant 0 : index
    %c0_0 = arith.constant 0 : index
    %c0_1 = arith.constant 0 : index
    %0 = vector.load %arg1[%c0, %c0_0, %c0_1] : memref<1x32x256xf32, #tpu.memory_space<vmem>>, vector<1x32x256xf32>
    %cst = arith.constant dense<0.000000e+00> : vector<1x32xf32>
    %1 = vector.multi_reduction <add>, %0, %cst [2] : vector<1x32x256xf32> to vector<1x32xf32>
    %2 = vector.shape_cast %1 : vector<1x32xf32> to vector<1x32x1xf32>
    %c0_2 = arith.constant 0 : index
    %c0_3 = arith.constant 0 : index
    %3 = vector.load %arg2[%c0_2, %c0_3] : memref<32x2xf32, #tpu.memory_space<vmem>>, vector<32x2xf32>
    %4 = vector.shape_cast %3 : vector<32x2xf32> to vector<1x32x2xf32>
    %5 = vector.broadcast %2 : vector<1x32x1xf32> to vector<1x32x2xf32>
    %6 = arith.mulf %5, %4 : vector<1x32x2xf32>
    %cst_4 = arith.constant dense<0.000000e+00> : vector<1x2xf32>
    %7 = vector.multi_reduction <add>, %6, %cst_4 [1] : vector<1x32x2xf32> to vector<1x2xf32>
    %c0_5 = arith.constant 0 : index
    %c0_6 = arith.constant 0 : index
    %8 = vector.load %arg3[%c0_5, %c0_6] : memref<1x2xf32, #tpu.memory_space<vmem>>, vector<1x2xf32>
    %9 = arith.addf %7, %8 : vector<1x2xf32>
    %cst_7 = arith.constant 0.000000e+00 : f32
    %10 = vector.broadcast %cst_7 : f32 to vector<1x2xf32>
    %11 = arith.maximumf %9, %10 : vector<1x2xf32>
    %12 = vector.shape_cast %11 : vector<1x2xf32> to vector<1x1x2xf32>
    %c0_8 = arith.constant 0 : index
    %c0_9 = arith.constant 0 : index
    %13 = vector.load %arg4[%c0_8, %c0_9] : memref<32x2xf32, #tpu.memory_space<vmem>>, vector<32x2xf32>
    %14 = vector.shape_cast %13 : vector<32x2xf32> to vector<1x32x2xf32>
    %15 = vector.broadcast %12 : vector<1x1x2xf32> to vector<1x32x2xf32>
    %16 = arith.mulf %15, %14 : vector<1x32x2xf32>
    %cst_10 = arith.constant dense<0.000000e+00> : vector<1x32xf32>
    %17 = vector.multi_reduction <add>, %16, %cst_10 [2] : vector<1x32x2xf32> to vector<1x32xf32>
    %c0_11 = arith.constant 0 : index
    %c0_12 = arith.constant 0 : index
    %18 = vector.load %arg5[%c0_11, %c0_12] : memref<1x32xf32, #tpu.memory_space<vmem>>, vector<1x32xf32>
    %19 = arith.addf %17, %18 : vector<1x32xf32>
    %20 = math.absf %19 : vector<1x32xf32>
    %cst_13 = arith.constant 0.000000e+00 : f32
    %21 = vector.broadcast %cst_13 : f32 to vector<1x32xf32>
    %22 = arith.subf %21, %20 : vector<1x32xf32>
    %23 = math.exp %22 : vector<1x32xf32>
    %cst_14 = arith.constant 0.000000e+00 : f32
    %24 = vector.broadcast %cst_14 : f32 to vector<1x32xf32>
    %25 = arith.cmpf oge, %19, %24 : vector<1x32xf32>
    %cst_15 = arith.constant 1.000000e+00 : f32
    %26 = vector.broadcast %cst_15 : f32 to vector<1x32xf32>
    %27 = arith.select %25, %26, %23 : vector<1x32xi1>, vector<1x32xf32>
    %cst_16 = arith.constant 1.000000e+00 : f32
    %28 = vector.broadcast %cst_16 : f32 to vector<1x32xf32>
    %29 = arith.addf %28, %23 : vector<1x32xf32>
    %30 = tpu.reciprocal %29 {approx = true} : vector<1x32xf32> -> vector<1x32xf32>
    %31 = arith.mulf %27, %30 : vector<1x32xf32>
    %c0_17 = arith.constant 0 : index
    %c0_18 = arith.constant 0 : index
    %c0_19 = arith.constant 0 : index
    %32 = vector.load %arg1[%c0_17, %c0_18, %c0_19] : memref<1x32x256xf32, #tpu.memory_space<vmem>>, vector<1x32x256xf32>
    %33 = vector.shape_cast %31 : vector<1x32xf32> to vector<1x32x1xf32>
    %34 = vector.broadcast %33 : vector<1x32x1xf32> to vector<1x32x256xf32>
    %35 = arith.mulf %32, %34 : vector<1x32x256xf32>
    %c0_20 = arith.constant 0 : index
    %c0_21 = arith.constant 0 : index
    %c0_22 = arith.constant 0 : index
    %36 = vector.load %arg6[%c0_20, %c0_21, %c0_22] : memref<1x32x256xf32, #tpu.memory_space<vmem>>, vector<1x32x256xf32>
    tpu.vector_store %arg6[%c0_20, %c0_21, %c0_22], %35 {strides = array<i32>} : memref<1x32x256xf32, #tpu.memory_space<vmem>>, vector<1x32x256xf32>,
    return
  }
  func.func @transform_0(%arg0: i32) -> (i32, i32, i32) {
    %c0_i32 = arith.constant 0 : i32
    %c0_i32_0 = arith.constant 0 : i32
    %c0_i32_1 = arith.constant 0 : i32
    return %arg0, %c0_i32, %c0_i32_0 : i32, i32, i32
  }
  func.func @transform_1(%arg0: i32) -> (i32, i32) {
    %c0_i32 = arith.constant 0 : i32
    %c0_i32_0 = arith.constant 0 : i32
    %c0_i32_1 = arith.constant 0 : i32
    return %c0_i32, %c0_i32_0 : i32, i32
  }
  func.func @transform_2(%arg0: i32) -> (i32, i32) {
    %c0_i32 = arith.constant 0 : i32
    %c0_i32_0 = arith.constant 0 : i32
    %c0_i32_1 = arith.constant 0 : i32
    return %c0_i32, %c0_i32_0 : i32, i32
  }
  func.func @transform_3(%arg0: i32) -> (i32, i32) {
    %c0_i32 = arith.constant 0 : i32
    %c0_i32_0 = arith.constant 0 : i32
    %c0_i32_1 = arith.constant 0 : i32
    return %c0_i32, %c0_i32_0 : i32, i32
  }
  func.func @transform_4(%arg0: i32) -> (i32, i32) {
    %c0_i32 = arith.constant 0 : i32
    %c0_i32_0 = arith.constant 0 : i32
    %c0_i32_1 = arith.constant 0 : i32
    return %c0_i32, %c0_i32_0 : i32, i32
  }
  func.func @transform_5(%arg0: i32) -> (i32, i32, i32) {
    %c0_i32 = arith.constant 0 : i32
    %c0_i32_0 = arith.constant 0 : i32
    %c0_i32_1 = arith.constant 0 : i32
    return %arg0, %c0_i32, %c0_i32_0 : i32, i32, i32
  }
}

</mosaic_0001>

<bundles_post_ra>
// kernel: ca_layer.1
= control target key start
LH: loop header
LB: loop body
LE: loop exit
PB: predicated region body
PF: predicated region fallthrough
CT: control target
= control target key end

     0   :  { %s530_s18 = smov 0   ;;  %s624_s0 = inlined_call_operand.vmem [shape: f32[2,32,256], index: 0, kind: input, shape index: {}]   ;;  %s625_s1 = inlined_call_operand.vmem [shape: f32[32,2], index: 1, kind: input, shape index: {}]   ;;  %s626_s2 = inlined_call_operand.vmem [shape: f32[1,2], index: 2, kind: input, shape index: {}]   ;;  %s627_s3 = inlined_call_operand.vmem [shape: f32[32,2], index: 3, kind: input, shape index: {}]   ;;  %s628_s4 = inlined_call_operand.vmem [shape: f32[1,32], index: 4, kind: input, shape index: {}]   ;;  %s629_s5 = inlined_call_operand.vmem [shape: f32[2,32,256], index: 5, kind: output, shape index: {}]  }
   0x1 LB: > { %s450_s19 = sadd.s32 4294967295, %s497_s18   ;;  %p454_p0 = scmp.ge.s32.totalorder %s497_s18, 1  ;;  %s497_s18 = sphi %s530_s18, %s15_s18  }
   0x2   : > { %p187_p1 = scmp.lt.s32.totalorder %s497_s18, 3 }
   0x4   : > { %p188_p2 = pnand %p454_p0, %p187_p1 }
   0x5   : > { %p215_p3 = scmp.lt.s32.totalorder (!%p188_p2), %s450_s19, 1 }
   0x6   : > { %191 = sbr.rel (%p188_p2) target bundleno = 555 (0x22b), region = 40 }
   0xb   : > { %s631_s19 = smov (!%p215_p3, %s450_s19), 1  ;;  %v245_v12 = vld [vmem:[%s625_s1] sm:$0xff]  ;;  %v247_v15 = vld [vmem:[%s625_s1 + $0x10] sm:$0xff]  ;;  %v246_v16 = vld [vmem:[%s625_s1 + $0x8] sm:$0xff]  ;;  %vm253_vm0 = vcmask 15360   ;;  %v274_v34 = vlaneseq  ;;  %v499_v54 = vmov 0  }
   0xc   : > { %s462_s20 = sshll.u32 %s631_s19, 6  ;;  %v248_v18 = vld [vmem:[%s625_s1 + $0x18] sm:$0xff]  ;;  %v267_v38 = vld [vmem:[%s626_s2] sm:$0x1]  ;;  %v271_v43 = vld [vmem:[%s627_s3 + $0x8] sm:$0xff]  ;;  %474 = vset.pattern.permute.xlu1 %v499_v54  ;;  %473 = vset.pattern.permute.xlu0 %v499_v54 }
   0xd   : > { %s219_s23 = scalar_lea.vmem %s624_s0, %s462_s20  ;;  %v275_v37 = vshrl.u32 %v274_v34, 7  ;;  %v270_v44 = vld [vmem:[%s627_s3] sm:$0xff]  ;;  %v272_v46 = vld [vmem:[%s627_s3 + $0x10] sm:$0xff]  ;;  %v273_v55 = vld [vmem:[%s627_s3 + $0x18] sm:$0xff]  ;;  %s224_s24 = scalar_lea.vmem %s629_s5, %s462_s20 }
   0xe   : > { %v546_v0 = vld [vmem:[%s219_s23] sm:$0xff]  ;;  %v548_v1 = vld [vmem:[%s219_s23 + $0x8] sm:$0xff]  ;;  %v556_v5 = vld [vmem:[%s219_s23 + $0x10] sm:$0xff] }
   0xf   : > { %v550_v2 = vld [vmem:[%s219_s23 + $0x20] sm:$0xff]  ;;  %v233_v3 = vadd.f32 %v548_v1, %v546_v0  ;;  %v554_v4 = vld [vmem:[%s219_s23 + $0x28] sm:$0xff]  ;;  %v558_v6 = vld [vmem:[%s219_s23 + $0x18] sm:$0xff]  ;;  %v276_v41 = vsub.s32 0, %v275_v37 }
  0x10   : > { %v239_v7 = vadd.f32 %v554_v4, %v550_v2  ;;  %v562_v8 = vld [vmem:[%s219_s23 + $0x30] sm:$0xff]  ;;  %v564_v9 = vld [vmem:[%s219_s23 + $0x38] sm:$0xff]  ;;  %v236_v10 = vadd.f32 %v558_v6, %v556_v5  ;;  %v459_v53 = vld [vmem:[%s628_s4] ss:$0 sm:$0xff] }
  0x11   : > { %234 = vadd.xlane.f32.xlu0 %v233_v3  ;;  %v242_v11 = vadd.f32 %v564_v9, %v562_v8 }
  0x12   : > { %240 = vadd.xlane.f32.xlu1 %v239_v7 }
  0x15   : > { %237 = vadd.xlane.f32.xlu0 %v236_v10 }
  0x16   : > { %243 = vadd.xlane.f32.xlu1 %v242_v11 }
  0x9a   : > { %v235_v13 = vpop.xlane.xlu0 %234 }
  0x9b   : > { %v241_v14 = vpop.xlane.xlu1 %240  ;;  %v249_v17 = vmul.f32 %v245_v12, %v235_v13 }
  0x9c   : > { %v251_v20 = vmul.f32 %v247_v15, %v241_v14 }
  0x9d   : > { %v254_v24 = vsel %vm253_vm0, %v249_v17, 0.0 }
  0x9e   : > { %v238_v19 = vpop.xlane.xlu0 %237  ;;  %v257_v27 = vsel %vm253_vm0, %v251_v20, 0.0 }
  0x9f   : > { %v250_v21 = vmul.f32 %v246_v16, %v238_v19  ;;  %v244_v22 = vpop.xlane.xlu1 %243 }
  0xa0   : > { %v252_v23 = vmul.f32 %v248_v18, %v244_v22 }
  0xa1   : > { %v255_v25 = vsel %vm253_vm0, %v250_v21, 0.0 }
  0xa2   : > { %v256_v26 = vadd.f32 %v255_v25, %v254_v24  ;;  %v259_v28 = vsel %vm253_vm0, %v252_v23, 0.0 }
  0xa4   : > { %v258_v29 = vadd.f32 %v257_v27, %v256_v26 }
  0xa6   : > { %v260_v30 = vadd.f32 %v259_v28, %v258_v29 }
  0xa8   : > { %v261_v31 = vrot.slane %v260_v30, 4 }
  0xaa   : > { %v262_v32 = vadd.f32 %v261_v31, %v260_v30 }
  0xac   : > { %v263_v33 = vrot.slane %v262_v32, 2 }
  0xae   : > { %v264_v35 = vadd.f32 %v263_v33, %v262_v32 }
  0xb0   : > { %v265_v36 = vrot.slane %v264_v35, 1 }
  0xb2   : > { %v266_v39 = vadd.f32 %v265_v36, %v264_v35 }
  0xb4   : > { %v268_v40 = vadd.f32 %v267_v38, %v266_v39 }
  0xb6   : > { %v269_v42 = vmax.f32 %v268_v40, 0.0 }
  0xb8   : > { %v277_v45 = vrot.slane %v269_v42, %v276_v41 }
  0xba   : > { %v279_v47 = vmul.f32 %v277_v45, %v271_v43  ;;  %v278_v48 = vmul.f32 %v277_v45, %v270_v44  ;;  %v280_v51 = vmul.f32 %v277_v45, %v272_v46  ;;  %v281_v56 = vmul.f32 %v277_v45, %v273_v55 }
  0xbc   : > { %v285_v49 = vsel %vm253_vm0, %v279_v47, 0.0  ;;  %v282_v50 = vsel %vm253_vm0, %v278_v48, 0.0  ;;  %v288_v52 = vsel %vm253_vm0, %v280_v51, 0.0  ;;  %v291_v57 = vsel %vm253_vm0, %v281_v56, 0.0 }
  0xbd   : > { %286 = vadd.xlane.f32.xlu1 %v285_v49  ;;  %283 = vadd.xlane.f32.xlu0 %v282_v50 }
  0xc1   : > { %289 = vadd.xlane.f32.xlu0 %v288_v52 }
  0xce   : > { %305 = vbcast.lane.b32.xlu1 %v459_v53, 264 }
  0xd2   : > { %309 = vbcast.lane.b32.xlu1 %v459_v53, 272 }
  0xd7   : > { %301 = vbcast.lane.b32.xlu0 %v459_v53, 256 }
  0xf6   : > { %292 = vadd.xlane.f32.xlu1 %v291_v57 }
 0x107   : > { %313 = vbcast.lane.b32.xlu1 %v459_v53, 280 }
 0x146   : > { %v287_v58 = vpop.xlane.xlu1 %286  ;;  %v284_v59 = vpop.xlane.xlu0 %283 }
 0x14a   : > { %v306_v60 = vpop.permute.xlu1 %305  ;;  %v290_v61 = vpop.xlane.xlu0 %289 }
 0x14b   : > { %v320_v62 = vadd.f32 %v306_v60, %v287_v58 }
 0x14d   : > { %v324_v63 = vand.u32 2147483647, %v320_v62  ;;  %vm340_vm1 = vcmp.ge.f32.partialorder %v320_v62, 0.0 }
 0x14e   : > { %v310_v3 = vpop.permute.xlu1 %309  ;;  %v302_v7 = vpop.permute.xlu0 %301 }
 0x14f   : > { %v328_v10 = vsub.f32 0.0, %v324_v63  ;;  %v321_v11 = vadd.f32 %v310_v3, %v290_v61  ;;  %v319_v12 = vadd.f32 %v302_v7, %v284_v59 }
 0x151   : > { %v333_v13 = vmul.f32 1.442695, %v328_v10  ;;  %v325_v14 = vand.u32 2147483647, %v321_v11  ;;  %v323_v15 = vand.u32 2147483647, %v319_v12 }
 0x152   : > { %vm341_vm2 = vcmp.ge.f32.partialorder %v321_v11, 0.0  ;;  %vm339_vm3 = vcmp.ge.f32.partialorder %v319_v12, 0.0 }
 0x153   : > { %475 = vpow2.f32 %v333_v13  ;;  %v329_v16 = vsub.f32 0.0, %v325_v14  ;;  %v327_v17 = vsub.f32 0.0, %v323_v15 }
 0x155   : > { %v335_v18 = vmul.f32 1.442695, %v329_v16  ;;  %v331_v19 = vmul.f32 1.442695, %v327_v17 }
 0x157   : > { %477 = vpow2.f32 %v335_v18 }
 0x158   : > { %479 = vpow2.f32 %v331_v19 }
 0x160   : > { %v476_v20 = vpop.eup %475 }
 0x161   : > { %v348_v21 = vadd.f32 1.0, %v476_v20  ;;  %v344_v27 = vsel %vm340_vm1, 1.0, %v476_v20 }
 0x163   : > { %481 = vrcp.f32 %v348_v21 }
 0x164   : > { %v478_v22 = vpop.eup %477 }
 0x165   : > { %v480_v23 = vpop.eup %479  ;;  %v349_v24 = vadd.f32 1.0, %v478_v22  ;;  %v345_v30 = vsel %vm341_vm2, 1.0, %v478_v22 }
 0x166   : > { %v347_v25 = vadd.f32 1.0, %v480_v23  ;;  %v343_v32 = vsel %vm339_vm3, 1.0, %v480_v23 }
 0x167   : > { %483 = vrcp.f32 %v349_v24 }
 0x168   : > { %485 = vrcp.f32 %v347_v25 }
 0x170   : > { %v482_v26 = vpop.eup %481 }
 0x171   : > { %v356_v28 = vmul.f32 %v482_v26, %v344_v27 }
 0x173   : > { %366 = vperm.xlu1 %474, %v356_v28  }
 0x174   : > { %v484_v29 = vpop.eup %483 }
 0x175   : > { %v486_v31 = vpop.eup %485  ;;  %v357_v33 = vmul.f32 %v484_v29, %v345_v30 }
 0x176   : > { %v355_v34 = vmul.f32 %v486_v31, %v343_v32 }
 0x177   : > { %371 = vperm.xlu1 %474, %v357_v33  }
 0x178   : > { %361 = vperm.xlu0 %473, %v355_v34  }
 0x17f   : > { %v293_v35 = vpop.xlane.xlu1 %292 }
 0x183   : > { %v314_v36 = vpop.permute.xlu1 %313 }
 0x184   : > { %v322_v37 = vadd.f32 %v314_v36, %v293_v35 }
 0x186   : > { %v326_v38 = vand.u32 2147483647, %v322_v37  ;;  %vm342_vm4 = vcmp.ge.f32.partialorder %v322_v37, 0.0 }
 0x188   : > { %v330_v39 = vsub.f32 0.0, %v326_v38 }
 0x18a   : > { %v337_v40 = vmul.f32 1.442695, %v330_v39 }
 0x18c   : > { %487 = vpow2.f32 %v337_v40 }
 0x199   : > { %v488_v41 = vpop.eup %487 }
 0x19a   : > { %v350_v42 = vadd.f32 1.0, %v488_v41  ;;  %v346_v44 = vsel %vm342_vm4, 1.0, %v488_v41 }
 0x19c   : > { %489 = vrcp.f32 %v350_v42 }
 0x1a9   : > { %v490_v43 = vpop.eup %489 }
 0x1aa   : > { %v358_v45 = vmul.f32 %v490_v43, %v346_v44 }
 0x1ac   : > { %376 = vperm.xlu0 %473, %v358_v45  }
 0x1ee   : > { %v367_v46 = vpop.permute.xlu1 %366 }
 0x1ef   : > { %v381_v47 = vmul.f32 %v367_v46, %v556_v5  ;;  %v382_v48 = vmul.f32 %v367_v46, %v558_v6 }
 0x1f1   : > { %389 = vst [vmem:[%s224_s24 + $0x10] sm:$0xff] %v381_v47  ;;  %390 = vst [vmem:[%s224_s24 + $0x18] sm:$0xff] %v382_v48 }
 0x1f2   : > { %v372_v49 = vpop.permute.xlu1 %371 }
 0x1f3   : > { %v383_v50 = vmul.f32 %v372_v49, %v550_v2  ;;  %v384_v51 = vmul.f32 %v372_v49, %v554_v4  ;;  %v362_v52 = vpop.permute.xlu0 %361 }
 0x1f4   : > { %v379_v53 = vmul.f32 %v362_v52, %v546_v0  ;;  %v380_v54 = vmul.f32 %v362_v52, %v548_v1 }
 0x1f5   : > { %391 = vst [vmem:[%s224_s24 + $0x20] sm:$0xff] %v383_v50  ;;  %392 = vst [vmem:[%s224_s24 + $0x28] sm:$0xff] %v384_v51 }
 0x1f6   : > { %387 = vst [vmem:[%s224_s24] sm:$0xff] %v379_v53  ;;  %388 = vst [vmem:[%s224_s24 + $0x8] sm:$0xff] %v380_v54 }
 0x227   : > { %v377_v55 = vpop.permute.xlu0 %376 }
 0x228   : > { %v385_v5 = vmul.f32 %v377_v55, %v562_v8  ;;  %v386_v6 = vmul.f32 %v377_v55, %v564_v9 }
 0x22a   : > { %393 = vst [vmem:[%s224_s24 + $0x30] sm:$0xff] %v385_v5  ;;  %394 = vst [vmem:[%s224_s24 + $0x38] sm:$0xff] %v386_v6 }
 0x22b PF: > { %s15_s18 = sadd.s32 1, %s497_s18  }
 0x22c   : > { %p12_p4 = scmp.ge.s32.totalorder %s15_s18, 4  }
 0x22e   :  { %14 = sbr.rel (!%p12_p4) target bundleno = 1 (0x1), region = 70 }

</bundles_post_ra>
